<compile_context>
chip_gen: v6e
topology: v6e:2x2x1
jax: 0.10.0
libtpu: 0.0.40
codegen_flags: <defaults>
</compile_context>

<pallas_src>
import functools

import jax
import jax.numpy as jnp
from jax import lax
from jax.experimental import pallas as pl
from jax.experimental.pallas import tpu as pltpu


def _surv_loss_kernel(preds_ref, obss_ref, hits_ref, bins_ref, out_ref, acc_ref,
                      *, nb, F, R, chunk, n_chunks):
    one = jnp.float32(1.0)
    eps = jnp.float32(1e-12)

    # ---- hoisted, chunk-loop-invariant values (once per grid step) ----------
    lo_b = jnp.broadcast_to(bins_ref[:, 0:1], (R, chunk))   # bins[0, :-1]
    hi_b = jnp.broadcast_to(bins_ref[:, 1:2], (R, chunk))   # bins[0, 1:]
    c_b = jnp.broadcast_to(bins_ref[:, 2:3], (R, chunk))    # bin centers
    row = lax.broadcasted_iota(jnp.int32, (R, chunk), 0)
    grp_masks = [row >= (g * nb) for g in range(1, F)]      # sublane groups

    acc_ref[...] = jnp.zeros_like(acc_ref)

    @pl.loop(0, n_chunks)
    def _chunk(ci):
        off = pl.multiple_of(ci * chunk, chunk)
        p = preds_ref[:, pl.ds(off, chunk)]                  # (R, chunk)
        o2 = obss_ref[:, pl.ds(off, chunk)]                  # (F, chunk)
        h2 = hits_ref[:, pl.ds(off, chunk)]                  # (F, chunk)

        # Broadcast each group's obss/hits row to its nb sublanes (no HBM
        # expansion): sublane broadcast + select.
        obs = jnp.broadcast_to(o2[0:1, :], (R, chunk))
        hit = jnp.broadcast_to(h2[0:1, :], (R, chunk))
        for g in range(1, F):
            obs = jnp.where(grp_masks[g - 1],
                            jnp.broadcast_to(o2[g:g + 1, :], (R, chunk)), obs)
            hit = jnp.where(grp_masks[g - 1],
                            jnp.broadcast_to(h2[g:g + 1, :], (R, chunk)), hit)

        censored = obs * (one - hit)
        bins_hits = obs * hit
        # survived = (censored >= centers) OR (obss*hits >= bins[0, 1:])
        survived = jnp.logical_or(censored >= c_b, bins_hits >= hi_b)
        # event bins: bins[0, :-1] <= obss < bins[0, 1:]
        event = jnp.logical_and(obs >= lo_b, obs < hi_b)

        # l_h_x   = 1 + survived      * (preds - 1)
        # n_l_h_x = 1 - event * hits  *  preds
        l_h_x = jnp.where(survived, p, one)
        n_l_h_x = jnp.where(event, one - hit * p, one)

        # -log(clamp(a)) - log(clamp(b)) == -log(clamp(a) * clamp(b))
        prod = jnp.maximum(l_h_x, eps) * jnp.maximum(n_l_h_x, eps)
        acc_ref[...] += jnp.log(prod)

    # (R, chunk) -> (R, 128) partial via static lane-slice adds; negate; store.
    red = acc_ref[:, 0:128]
    for k in range(1, chunk // 128):
        red = red + acc_ref[:, k * 128:(k + 1) * 128]
    out_ref[0] = -red


def nn_surv_loss_simple(preds, obss, hits, bins, *, tile_n=32768):
    """Pallas implementation of NNSurvLossSimple.forward. Returns a scalar."""
    preds = jnp.asarray(preds, jnp.float32)
    obss = jnp.asarray(obss, jnp.float32).reshape(-1)
    hits = jnp.asarray(hits, jnp.float32).reshape(-1)
    bins_f = jnp.asarray(bins, jnp.float32).reshape(-1)

    n, nb = preds.shape
    assert bins_f.shape[0] == nb + 1
    assert obss.shape[0] == n and hits.shape[0] == n

    # Sublane fold factor: F sample groups on the sublane axis -> full vregs.
    F = 8 // nb if (nb <= 8 and 8 % nb == 0) else 1
    R = F * nb

    # Lane tile: big enough to amortize per-grid-step overhead, capped so the
    # grid has >= 2 steps whenever there is enough work (v7x dual-TC split).
    cols = pl.cdiv(n, F)                       # samples per sublane group
    half = pl.cdiv(cols, 2)
    tile = max(128, pl.cdiv(half, 128) * 128)
    tile = min(tile, max(128, (int(tile_n) // 128) * 128))
    chunk = 512 if tile >= 512 else tile       # register-resident inner chunk
    tile = pl.cdiv(tile, chunk) * chunk
    n_chunks = tile // chunk

    grid_n = pl.cdiv(cols, tile)
    H = grid_n * tile                          # padded columns per group
    P = F * H                                  # padded sample count

    # Neutral padding (preds=1, hits=0, obss=0 contributes exactly 0); fused by
    # XLA into the single packing copy below.
    pad = P - n
    if pad:
        preds_p = jnp.pad(preds, ((0, pad), (0, 0)), constant_values=1.0)
        obss_p = jnp.pad(obss, (0, pad))
        hits_p = jnp.pad(hits, (0, pad))
    else:
        preds_p, obss_p, hits_p = preds, obss, hits

    # Packed, lane-dense layouts (one HBM pass for preds; obss/hits reshapes
    # are pure row-major splits of the padded vectors).
    preds_packed = preds_p.reshape(F, H, nb).transpose(0, 2, 1).reshape(R, H)
    obss_g = obss_p.reshape(F, H)
    hits_g = hits_p.reshape(F, H)

    lo = bins_f[:-1]
    hi = bins_f[1:]
    ctr = (lo + hi) * 0.5
    bins_packed = jnp.tile(
        jnp.stack([lo, hi, ctr, jnp.zeros_like(lo)], axis=-1), (F, 1))  # (R, 4)

    kernel = functools.partial(_surv_loss_kernel, nb=nb, F=F, R=R,
                               chunk=chunk, n_chunks=n_chunks)

    partials = pl.pallas_call(
        kernel,
        out_shape=jax.ShapeDtypeStruct((grid_n, R, 128), jnp.float32),
        grid_spec=pltpu.PrefetchScalarGridSpec(
            num_scalar_prefetch=0,
            grid=(grid_n,),
            in_specs=[
                pl.BlockSpec((R, tile), lambda i: (0, i)),   # preds (packed)
                pl.BlockSpec((F, tile), lambda i: (0, i)),   # obss  (grouped)
                pl.BlockSpec((F, tile), lambda i: (0, i)),   # hits  (grouped)
                pl.BlockSpec((R, 4), lambda i: (0, 0)),      # bins  (resident)
            ],
            out_specs=pl.BlockSpec((1, R, 128), lambda i: (i, 0, 0)),
            scratch_shapes=[pltpu.VMEM((R, chunk), jnp.float32)],
        ),
        compiler_params=pltpu.CompilerParams(
            dimension_semantics=("parallel",)),
        cost_estimate=pl.CostEstimate(
            flops=22 * R * H,
            transcendentals=R * H,
            bytes_accessed=4 * (R * H + 2 * F * H + R * 4 + grid_n * R * 128)),
    )(preds_packed, obss_g, hits_g, bins_packed)

    return jnp.sum(partials)


def _reference(preds, obss, hits, bins):
    preds = jnp.asarray(preds, jnp.float32)
    obss = jnp.asarray(obss, jnp.float32).reshape(-1, 1)
    hits = jnp.asarray(hits, jnp.float32).reshape(-1, 1)
    bins = jnp.asarray(bins, jnp.float32)
    bin_lo, bin_hi = bins[0, :-1], bins[0, 1:]
    bin_c = (bin_lo + bin_hi) / 2

    censored = obss * (1 - hits)
    a = (censored >= bin_c).astype(jnp.float32)
    b = ((obss * hits) >= bin_hi).astype(jnp.float32)
    survived_bins = a + b - a * b
    event_bins = ((obss >= bin_lo) & (obss < bin_hi)).astype(jnp.float32)
    hit_bins = event_bins * hits
    l_h_x = 1 + survived_bins * (preds - 1)
    n_l_h_x = 1 - hit_bins * preds
    cat = jnp.concatenate((l_h_x, n_l_h_x), axis=0)
    return jnp.sum(-jnp.log(jnp.clip(cat, 1e-12)))


if __name__ == "__main__":
    key = jax.random.PRNGKey(0)
    bins = jnp.array([[0.0, 1.0, 2.0, 3.0, 4.0]], dtype=jnp.float32)  # (1, nb+1)
    nb = bins.shape[1] - 1                                            # 4 bins

    def make_case(k, n_samples):
        k1, k2, k3 = jax.random.split(k, 3)
        preds = jax.random.uniform(k1, (n_samples, nb), dtype=jnp.float32,
                                   minval=0.05, maxval=0.95)
        obss = jax.random.uniform(k2, (n_samples,), dtype=jnp.float32,
                                  minval=0.0, maxval=4.0)
        hits = (jax.random.uniform(k3, (n_samples,)) > 0.5).astype(jnp.float32)
        return preds, obss, hits

    keys = jax.random.split(key, 3)

    # Case 1: tiny batch -> single grid step, single chunk, heavy padding.
    p1, o1, h1 = make_case(keys[0], 16)
    out1 = nn_surv_loss_simple(p1, o1, h1, bins)
    jax.block_until_ready(out1)
    ref1 = _reference(p1, o1, h1, bins)
    assert jnp.allclose(out1, ref1, rtol=1e-3, atol=1e-3), (out1, ref1)

    # Case 2: ragged batch with a forced small tile -> 2 grid steps + padding.
    p2, o2, h2 = make_case(keys[1], 300)
    out2 = nn_surv_loss_simple(p2, o2, h2, bins, tile_n=128)
    jax.block_until_ready(out2)
    ref2 = _reference(p2, o2, h2, bins)
    assert jnp.allclose(out2, ref2, rtol=1e-3, atol=1e-3), (out2, ref2)

    # Case 3: default tiling -> multi-chunk inner loop + 2 grid steps + padding.
    p3, o3, h3 = make_case(keys[2], 5000)
    out3 = nn_surv_loss_simple(p3, o3, h3, bins)
    jax.block_until_ready(out3)
    ref3 = _reference(p3, o3, h3, bins)
    assert jnp.allclose(out3, ref3, rtol=1e-3, atol=1e-3), (out3, ref3)

    print("KERNEL_OK")
</pallas_src>

<mosaic_0001>
module attributes {stable_mosaic.version = 11 : i64} {
  func.func @_surv_loss_kernel(%arg0: i32, %arg1: memref<8x128xf32, #tpu.memory_space<vmem>>, %arg2: memref<2x128xf32, #tpu.memory_space<vmem>>, %arg3: memref<2x128xf32, #tpu.memory_space<vmem>>, %arg4: memref<8x4xf32, #tpu.memory_space<vmem>>, %arg5: memref<1x8x128xf32, #tpu.memory_space<vmem>>, %arg6: memref<8x128xf32, #tpu.memory_space<vmem>>) attributes {dimension_semantics = [#tpu.dimension_semantics<parallel>], iteration_bounds = array<i64: 1>, scalar_prefetch = 0 : i64, scratch_operands = 1 : i64, tpu.core_type = #tpu.core_type<tc>, window_params = [{transform_indices = @transform_0, window_bounds = array<i64: 8, 128>}, {transform_indices = @transform_1, window_bounds = array<i64: 2, 128>}, {transform_indices = @transform_2, window_bounds = array<i64: 2, 128>}, {pipeline_mode = #tpu.pipeline_mode<synchronous>, transform_indices = @transform_3, window_bounds = array<i64: 8, 4>}, {transform_indices = @transform_4, window_bounds = array<i64: 1, 8, 128>}]} {
    %c0 = arith.constant 0 : index
    %c0_0 = arith.constant 0 : index
    %0 = vector.load %arg4[%c0, %c0_0] : memref<8x4xf32, #tpu.memory_space<vmem>>, vector<8x1xf32>
    %1 = vector.shape_cast %0 : vector<8x1xf32> to vector<8x1xf32>
    %2 = vector.broadcast %1 : vector<8x1xf32> to vector<8x128xf32>
    %c0_1 = arith.constant 0 : index
    %c1 = arith.constant 1 : index
    %3 = vector.load %arg4[%c0_1, %c1] : memref<8x4xf32, #tpu.memory_space<vmem>>, vector<8x1xf32>
    %4 = vector.shape_cast %3 : vector<8x1xf32> to vector<8x1xf32>
    %5 = vector.broadcast %4 : vector<8x1xf32> to vector<8x128xf32>
    %c0_2 = arith.constant 0 : index
    %c2 = arith.constant 2 : index
    %6 = vector.load %arg4[%c0_2, %c2] : memref<8x4xf32, #tpu.memory_space<vmem>>, vector<8x1xf32>
    %7 = vector.shape_cast %6 : vector<8x1xf32> to vector<8x1xf32>
    %8 = vector.broadcast %7 : vector<8x1xf32> to vector<8x128xf32>
    %9 = tpu.iota {dimensions = array<i32: 0>} : vector<8x128xi32>
    %c4_i32 = arith.constant 4 : i32
    %10 = vector.broadcast %c4_i32 : i32 to vector<8x128xi32>
    %11 = arith.cmpi sge, %9, %10 : vector<8x128xi32>
    %cst = arith.constant 0.000000e+00 : f32
    %12 = vector.broadcast %cst : f32 to vector<8x128xf32>
    %c0_3 = arith.constant 0 : index
    %c0_4 = arith.constant 0 : index
    %13 = vector.load %arg6[%c0_3, %c0_4] : memref<8x128xf32, #tpu.memory_space<vmem>>, vector<8x128xf32>
    tpu.vector_store %arg6[%c0_3, %c0_4], %12 {strides = array<i32>} : memref<8x128xf32, #tpu.memory_space<vmem>>, vector<8x128xf32>,
    %cst_5 = arith.constant 1.000000e+00 : f32
    %cst_6 = arith.constant 9.99999996E-13 : f32
    %c0_i32 = arith.constant 0 : i32
    %c1_i32 = arith.constant 1 : i32
    %14 = arith.muli %c0_i32, %c1_i32 : i32
    %c0_i32_7 = arith.constant 0 : i32
    %15 = arith.addi %c0_i32_7, %14 : i32
    %c128_i32 = arith.constant 128 : i32
    %16 = arith.muli %15, %c128_i32 : i32
    %17 = tpu.assume_multiple %16, 128 : i32
    %c0_8 = arith.constant 0 : index
    %18 = arith.index_cast %17 : i32 to index
    %19 = vector.load %arg1[%c0_8, %18] : memref<8x128xf32, #tpu.memory_space<vmem>>, vector<8x128xf32>
    %c0_9 = arith.constant 0 : index
    %20 = arith.index_cast %17 : i32 to index
    %21 = vector.load %arg2[%c0_9, %20] : memref<2x128xf32, #tpu.memory_space<vmem>>, vector<2x128xf32>
    %c0_10 = arith.constant 0 : index
    %22 = arith.index_cast %17 : i32 to index
    %23 = vector.load %arg3[%c0_10, %22] : memref<2x128xf32, #tpu.memory_space<vmem>>, vector<2x128xf32>
    %24 = vector.extract_strided_slice %21 {offsets = [0, 0], sizes = [1, 128], strides = [1, 1]} : vector<2x128xf32> to vector<1x128xf32>
    %25 = vector.shape_cast %24 : vector<1x128xf32> to vector<1x128xf32>
    %26 = vector.broadcast %25 : vector<1x128xf32> to vector<8x128xf32>
    %27 = vector.extract_strided_slice %23 {offsets = [0, 0], sizes = [1, 128], strides = [1, 1]} : vector<2x128xf32> to vector<1x128xf32>
    %28 = vector.shape_cast %27 : vector<1x128xf32> to vector<1x128xf32>
    %29 = vector.broadcast %28 : vector<1x128xf32> to vector<8x128xf32>
    %30 = vector.extract_strided_slice %21 {offsets = [1, 0], sizes = [1, 128], strides = [1, 1]} : vector<2x128xf32> to vector<1x128xf32>
    %31 = vector.shape_cast %30 : vector<1x128xf32> to vector<1x128xf32>
    %32 = vector.broadcast %31 : vector<1x128xf32> to vector<8x128xf32>
    %33 = arith.select %11, %32, %26 : vector<8x128xi1>, vector<8x128xf32>
    %34 = vector.extract_strided_slice %23 {offsets = [1, 0], sizes = [1, 128], strides = [1, 1]} : vector<2x128xf32> to vector<1x128xf32>
    %35 = vector.shape_cast %34 : vector<1x128xf32> to vector<1x128xf32>
    %36 = vector.broadcast %35 : vector<1x128xf32> to vector<8x128xf32>
    %37 = arith.select %11, %36, %29 : vector<8x128xi1>, vector<8x128xf32>
    %38 = vector.broadcast %cst_5 : f32 to vector<8x128xf32>
    %39 = arith.subf %38, %37 : vector<8x128xf32>
    %40 = arith.mulf %33, %39 : vector<8x128xf32>
    %41 = arith.mulf %33, %37 : vector<8x128xf32>
    %42 = arith.cmpf oge, %40, %8 : vector<8x128xf32>
    %43 = arith.cmpf oge, %41, %5 : vector<8x128xf32>
    %44 = arith.ori %42, %43 : vector<8x128xi1>
    %45 = arith.cmpf oge, %33, %2 : vector<8x128xf32>
    %46 = arith.cmpf olt, %33, %5 : vector<8x128xf32>
    %47 = arith.andi %45, %46 : vector<8x128xi1>
    %48 = vector.broadcast %cst_5 : f32 to vector<8x128xf32>
    %49 = arith.select %44, %19, %48 : vector<8x128xi1>, vector<8x128xf32>
    %50 = arith.mulf %37, %19 : vector<8x128xf32>
    %51 = vector.broadcast %cst_5 : f32 to vector<8x128xf32>
    %52 = arith.subf %51, %50 : vector<8x128xf32>
    %53 = vector.broadcast %cst_5 : f32 to vector<8x128xf32>
    %54 = arith.select %47, %52, %53 : vector<8x128xi1>, vector<8x128xf32>
    %55 = vector.broadcast %cst_6 : f32 to vector<8x128xf32>
    %56 = arith.maximumf %49, %55 : vector<8x128xf32>
    %57 = vector.broadcast %cst_6 : f32 to vector<8x128xf32>
    %58 = arith.maximumf %54, %57 : vector<8x128xf32>
    %59 = arith.mulf %56, %58 : vector<8x128xf32>
    %c0_11 = arith.constant 0 : index
    %c0_12 = arith.constant 0 : index
    %60 = vector.load %arg6[%c0_11, %c0_12] : memref<8x128xf32, #tpu.memory_space<vmem>>, vector<8x128xf32>
    %61 = math.log %59 : vector<8x128xf32>
    %62 = arith.addf %60, %61 : vector<8x128xf32>
    %c0_13 = arith.constant 0 : index
    %c0_14 = arith.constant 0 : index
    %63 = vector.load %arg6[%c0_13, %c0_14] : memref<8x128xf32, #tpu.memory_space<vmem>>, vector<8x128xf32>
    tpu.vector_store %arg6[%c0_13, %c0_14], %62 {strides = array<i32>} : memref<8x128xf32, #tpu.memory_space<vmem>>, vector<8x128xf32>,
    %c1_i32_15 = arith.constant 1 : i32
    %c0_16 = arith.constant 0 : index
    %c0_17 = arith.constant 0 : index
    %64 = vector.load %arg6[%c0_16, %c0_17] : memref<8x128xf32, #tpu.memory_space<vmem>>, vector<8x128xf32>
    %cst_18 = arith.constant 0.000000e+00 : f32
    %65 = vector.broadcast %cst_18 : f32 to vector<8x128xf32>
    %66 = arith.subf %65, %64 : vector<8x128xf32>
    %c0_19 = arith.constant 0 : index
    %c0_20 = arith.constant 0 : index
    %c0_21 = arith.constant 0 : index
    %67 = vector.load %arg5[%c0_19, %c0_20, %c0_21] : memref<1x8x128xf32, #tpu.memory_space<vmem>>, vector<1x8x128xf32>
    %68 = vector.shape_cast %67 : vector<1x8x128xf32> to vector<8x128xf32>
    %69 = vector.shape_cast %66 : vector<8x128xf32> to vector<1x8x128xf32>
    tpu.vector_store %arg5[%c0_19, %c0_20, %c0_21], %69 {strides = array<i32>} : memref<1x8x128xf32, #tpu.memory_space<vmem>>, vector<1x8x128xf32>,
    return
  }
  func.func @transform_0(%arg0: i32) -> (i32, i32) {
    %c0_i32 = arith.constant 0 : i32
    %c0_i32_0 = arith.constant 0 : i32
    return %c0_i32, %arg0 : i32, i32
  }
  func.func @transform_1(%arg0: i32) -> (i32, i32) {
    %c0_i32 = arith.constant 0 : i32
    %c0_i32_0 = arith.constant 0 : i32
    return %c0_i32, %arg0 : i32, i32
  }
  func.func @transform_2(%arg0: i32) -> (i32, i32) {
    %c0_i32 = arith.constant 0 : i32
    %c0_i32_0 = arith.constant 0 : i32
    return %c0_i32, %arg0 : i32, i32
  }
  func.func @transform_3(%arg0: i32) -> (i32, i32) {
    %c0_i32 = arith.constant 0 : i32
    %c0_i32_0 = arith.constant 0 : i32
    %c0_i32_1 = arith.constant 0 : i32
    return %c0_i32, %c0_i32_0 : i32, i32
  }
  func.func @transform_4(%arg0: i32) -> (i32, i32, i32) {
    %c0_i32 = arith.constant 0 : i32
    %c0_i32_0 = arith.constant 0 : i32
    %c0_i32_1 = arith.constant 0 : i32
    return %arg0, %c0_i32, %c0_i32_0 : i32, i32, i32
  }
}

</mosaic_0001>

<bundles_post_ra>
// kernel: tpu_custom_call.1
= control target key start
LH: loop header
LB: loop body
LE: loop exit
PB: predicated region body
PF: predicated region fallthrough
CT: control target
= control target key end

     0   :  { %v127_v1 = vmov 0   ;;  %v128_v2 = vmov 2   ;;  %s171_s0 = inlined_call_operand.vmem [shape: f32[8,128], index: 0, kind: input, shape index: {}]   ;;  %s172_s1 = inlined_call_operand.vmem [shape: f32[2,128], index: 1, kind: input, shape index: {}]   ;;  %s173_s2 = inlined_call_operand.vmem [shape: f32[2,128], index: 2, kind: input, shape index: {}]   ;;  %s174_s3 = inlined_call_operand.vmem [shape: f32[8,4], index: 3, kind: input, shape index: {}]   ;;  %s175_s4 = inlined_call_operand.hbm [shape: f32[1,8,128], index: 4, kind: output, shape index: {}]  }
   0x1   :  { %v18_v0 = vld [vmem:[%s174_s3] sm:$0xff]  ;;  %99 = vset.pattern.permute.xlu0 %v127_v1  ;;  %101 = vset.pattern.permute.xlu1 %v128_v2 }
   0x2   :  { %9 = vsyncpa [#allocation4], 0  ;;  %21 = vperm.xlu0 %99, %v18_v0   ;;  %29 = vperm.xlu1 %101, %v18_v0   ;;  %v129_v3 = vmov 1   ;;  %v32_v4 = vlaneseq  ;;  %v38_v8 = vld [vmem:[%s173_s2] sm:$0x3] }
   0x3   :  { %v37_v11 = vld [vmem:[%s172_s1] sm:$0x3] }
   0x4   :  { %v33_v5 = vshrl.u32 %v32_v4, 7  ;;  %v36_v16 = vld [vmem:[%s171_s0] sm:$0xff]  ;;  %s130_s0 = smov [#allocation3]  }
   0x5   :  { %s87_s1 = sshll.u32 %s130_s0, 4  ;;  %s88_s1 = int_to_ptr.vmem [resolvable:$true] %s87_s1 }
   0x6   :  { %100 = vset.pattern.permute.xlu0 %v129_v3  ;;  %v41_v6 = vsub.s32 0, %v33_v5  ;;  %v49_v7 = vsub.s32 1, %v33_v5  ;;  %vm34_vm0 = vcmp.ge.s32.totalorder %v33_v5, 4  ;;  %s105_s2 = scalar_lea.vmem %s88_s1, 128  ;;  %p110_p1 = scmp.lt.s32.totalorder %s88_s1, %s88_s1 }
   0x7   :  { %25 = vperm.xlu0 %100, %v18_v0   ;;  %p106_p0 = scmp.ne.s32.totalorder %s88_s1, %s105_s2  ;;  %p111_p2 = scmp.lt.s32.totalorder %s105_s2, %s105_s2 }
   0x8   :  { %v46_v9 = vrot.slane %v38_v8, %v41_v6  ;;  %v55_v10 = vrot.slane %v38_v8, %v49_v7  ;;  %v42_v13 = vrot.slane %v37_v11, %v41_v6  ;;  %v50_v14 = vrot.slane %v37_v11, %v49_v7 }
   0x9   :  { %p112_p3 = por %p111_p2, %p110_p1 }
   0xa   :  { %v56_v12 = vsel %vm34_vm0, %v55_v10, %v46_v9  ;;  %v51_v17 = vsel %vm34_vm0, %v50_v14, %v42_v13 }
   0xb   :  { %102 = vset.pattern.permute.xlu0 %v128_v2  ;;  %v57_v15 = vsub.f32 1.0, %v56_v12  ;;  %v67_v21 = vmul.f32 %v56_v12, %v36_v16  ;;  %v59_v22 = vmul.f32 %v56_v12, %v51_v17  ;;  %p113_p4 = pnand %p112_p3, %p106_p0 }
   0xd   :  { %v58_v19 = vmul.f32 %v57_v15, %v51_v17  ;;  %v68_v23 = vsub.f32 1.0, %v67_v21 }
  0x7d   :  { %v22_v18 = vpop.permute.xlu0 %21  ;;  %v30_v20 = vpop.permute.xlu1 %29 }
  0x7e   :  { %vm60_vm1 = vcmp.ge.f32.partialorder %v58_v19, %v30_v20  ;;  %vm63_vm4 = vcmp.ge.f32.partialorder %v51_v17, %v22_v18 }
  0x82   :  { %v26_v24 = vpop.permute.xlu0 %25 }
  0x83   :  { %vm61_vm2 = vcmp.ge.f32.partialorder %v59_v22, %v26_v24  ;;  %vm64_vm3 = vcmp.lt.f32.partialorder %v51_v17, %v26_v24 }
  0x84   :  { %vm62_vm5 = vmor %vm60_vm1, %vm61_vm2 }
  0x85   :  { %vm65_vm6 = vmand %vm63_vm4, %vm64_vm3  ;;  %v66_v25 = vsel %vm62_vm5, %v36_v16, 1.0 }
  0x86   :  { %v69_v26 = vsel %vm65_vm6, %v68_v23, 1.0  ;;  %v70_v27 = vmax.f32 %v66_v25, 1e-12 }
  0x87   :  { %v71_v28 = vmax.f32 %v69_v26, 1e-12 }
  0x89   :  { %v72_v29 = vmul.f32 %v71_v28, %v70_v27 }
  0x8b   :  { %103 = vlog2.f32 %v72_v29 }
  0x98   :  { %v104_v30 = vpop.eup %103 }
  0x99   :  { %v75_v31 = vmul.f32 0.6931472, %v104_v30 }
  0x9b   :  { %v79_v32 = vsub.f32 0.0, %v75_v31 }
  0x9d   :  { %80 = vst [vmem:[#allocation3] sm:$0xff] %v79_v32 }
  0x9e   :  { %116 = shalt.err (!%p113_p4)
}
  0x9f   :  { %90 = dma.vmem_to_hbm [thread:$0]  %s88_s1, 128, %s175_s4, [#allocation4]  }
  0xa0   :  { %125 = dma.done.wait [#allocation4], 128  }
  0xa1   :  { %126 = vsyncadd [#allocation4], 4294967168 }
  0xa2   :  { %94 = vsyncpa [#allocation4], 1 }

</bundles_post_ra>
